<compile_context>
chip_gen: v7x
topology: tpu7x:2x2x1
jax: 0.10.0
libtpu: 0.0.40
codegen_flags: <defaults>
</compile_context>

<pallas_src>
import functools

import jax
import jax.numpy as jnp
from jax.experimental import pallas as pl
from jax.experimental.pallas import tpu as pltpu


def _round_up(v, m):
    return ((v + m - 1) // m) * m


def _sage_en_kernel(adj_ref, xk_ref, xm_ref, w1_ref, w2_ref, o_ref, acc_ref):
    """Grid = (i: row tiles, k: reduction tiles over adjacency columns)."""
    k = pl.program_id(1)

    @pl.when(k == 0)
    def _init():
        acc_ref[...] = jnp.zeros_like(acc_ref)

    # (TM, TK) bf16 @ (TK, F_pad) bf16 -> f32 accumulation on the MXU.
    # Column 0 of x is all ones, so acc[:, 0] accumulates the row degree.
    acc_ref[...] += jnp.dot(adj_ref[...], xk_ref[...],
                            preferred_element_type=jnp.float32)

    @pl.when(k == pl.num_programs(1) - 1)
    def _epilogue():
        acc = acc_ref[...]                                  # (TM, F_pad) f32
        deg = acc[:, 0:1]                                   # (TM, 1) row degree
        inv = pl.reciprocal(deg + 1.0, approx=True)         # EUP slot (free-ish)
        neigh = (acc * inv).astype(xm_ref.dtype)            # bf16 for the MXU
        # proj(concat([x, neigh])) == x @ w1 + neigh @ w2.
        # Padded weight rows are zero, so the ones column / zero padding of
        # x and neigh contribute nothing.
        out = jnp.dot(xm_ref[...], w1_ref[...], preferred_element_type=jnp.float32)
        out = out + jnp.dot(neigh, w2_ref[...], preferred_element_type=jnp.float32)
        o_ref[...] = jnp.maximum(out, 0.0)


def sage_en_forward(x, adj, w1, w2):
    """x:(N,F) f32, adj:(N,N) f32, w1/w2:(F,E) f32 -> (N,E) f32."""
    n, nfeat = x.shape
    nembed = w1.shape[1]

    # ---- tile / padding selection -----------------------------------------
    n128 = _round_up(n, 128)
    if n128 <= 512:
        n_pad, tm, tk = n128, n128, n128          # single tile per axis
    else:
        tk = 512                                  # reduction tile (lane aligned)
        tm = 256                                  # row tile (fits v7x 64 MiB VMEM)
        n_pad = _round_up(n, tk)                  # tk % tm == 0  =>  tm | n_pad
    f_pad = _round_up(nfeat + 1, 128)             # [ones | features | zero pad]
    e_pad = _round_up(nembed, 128)                # lane-dense output stores

    # ---- pad + cast (adj is 0/1 so bf16 is exact) ---------------------------
    x_aug = jnp.concatenate([jnp.ones((n, 1), x.dtype), x], axis=1)     # ones col first
    x_p = jnp.pad(x_aug, ((0, n_pad - n), (0, f_pad - (nfeat + 1)))).astype(jnp.bfloat16)
    adj_p = jnp.pad(adj, ((0, n_pad - n), (0, n_pad - n))).astype(jnp.bfloat16)
    w1_p = jnp.pad(w1, ((1, f_pad - nfeat - 1), (0, e_pad - nembed))).astype(jnp.bfloat16)
    w2_p = jnp.pad(w2, ((1, f_pad - nfeat - 1), (0, e_pad - nembed))).astype(jnp.bfloat16)

    grid = (n_pad // tm, n_pad // tk)

    cost = pl.CostEstimate(
        flops=2 * n_pad * n_pad * f_pad + 4 * n_pad * f_pad * e_pad,
        transcendentals=n_pad,
        bytes_accessed=(adj_p.size * adj_p.dtype.itemsize
                        + 2 * x_p.size * x_p.dtype.itemsize
                        + 2 * w1_p.size * w1_p.dtype.itemsize
                        + n_pad * e_pad * 4),
    )

    out_p = pl.pallas_call(
        _sage_en_kernel,
        out_shape=jax.ShapeDtypeStruct((n_pad, e_pad), jnp.float32),
        grid_spec=pltpu.PrefetchScalarGridSpec(
            num_scalar_prefetch=0,
            grid=grid,
            in_specs=[
                pl.BlockSpec((tm, tk), lambda i, k: (i, k)),         # adj tile
                pl.BlockSpec((tk, f_pad), lambda i, k: (k, 0)),      # x rows k (aggregation)
                pl.BlockSpec((tm, f_pad), lambda i, k: (i, 0)),      # x rows i (self term)
                pl.BlockSpec((f_pad, e_pad), lambda i, k: (0, 0)),   # w1 (resident)
                pl.BlockSpec((f_pad, e_pad), lambda i, k: (0, 0)),   # w2 (resident)
            ],
            out_specs=pl.BlockSpec((tm, e_pad), lambda i, k: (i, 0)),
            scratch_shapes=[pltpu.VMEM((tm, f_pad), jnp.float32)],
        ),
        compiler_params=pltpu.CompilerParams(
            dimension_semantics=("parallel", "arbitrary"),   # megacore rows on v7x
            vmem_limit_bytes=32 * 1024 * 1024,
        ),
        cost_estimate=cost,
    )(adj_p, x_p, x_p, w1_p, w2_p)

    return out_p[:n, :nembed]


def sage_en_reference(x, adj, w1, w2):
    """Pure-JAX f32 reference of the PyTorch forward (eval-mode dropout)."""
    neigh = (adj @ x) / (jnp.sum(adj, axis=1, keepdims=True) + 1.0)
    out = x @ w1 + neigh @ w2
    return jnp.maximum(out, 0.0)


if __name__ == "__main__":
    # Small shapes consistent with Sage_En(nfeat, nhid, nembed, dropout).
    N, NFEAT, NEMBED = 8, 32, 16
    DROPOUT = 0.5  # F.dropout is identity at inference

    key = jax.random.PRNGKey(0)
    kx, kadj, kw = jax.random.split(key, 3)

    x = jax.random.normal(kx, (N, NFEAT), dtype=jnp.float32)

    # Symmetric 0/1 adjacency without self-loops.
    a = jax.random.uniform(kadj, (N, N)) < 0.4
    adj = jnp.triu(a.astype(jnp.float32), k=1)
    adj = adj + adj.T

    # proj.weight ~ Normal(0, 1), shape (nembed, 2*nfeat), bias=False.
    w_full = jax.random.normal(kw, (NEMBED, 2 * NFEAT), dtype=jnp.float32)
    w1 = w_full[:, :NFEAT].T   # (NFEAT, NEMBED) applied to self features
    w2 = w_full[:, NFEAT:].T   # (NFEAT, NEMBED) applied to neighbor mean

    out = jax.block_until_ready(sage_en_forward(x, adj, w1, w2))
    ref = sage_en_reference(x, adj, w1, w2)

    assert out.shape == (N, NEMBED)
    # bf16 MXU inputs + approx reciprocal vs pure-f32 reference -> relaxed tol.
    assert jnp.allclose(out, ref, atol=1e-1, rtol=1e-1), "mismatch vs reference"

    print("KERNEL_OK")
</pallas_src>

<mosaic_0001>
module attributes {stable_mosaic.version = 11 : i64} {
  func.func @_sage_en_kernel(%arg0: i32, %arg1: i32, %arg2: memref<128x128xbf16, #tpu.memory_space<vmem>>, %arg3: memref<128x128xbf16, #tpu.memory_space<vmem>>, %arg4: memref<128x128xbf16, #tpu.memory_space<vmem>>, %arg5: memref<128x128xbf16, #tpu.memory_space<vmem>>, %arg6: memref<128x128xbf16, #tpu.memory_space<vmem>>, %arg7: memref<128x128xf32, #tpu.memory_space<vmem>>, %arg8: memref<128x128xf32, #tpu.memory_space<vmem>>) attributes {dimension_semantics = [#tpu.dimension_semantics<parallel>, #tpu.dimension_semantics<arbitrary>], iteration_bounds = array<i64: 1, 1>, scalar_prefetch = 0 : i64, scratch_operands = 1 : i64, tpu.core_type = #tpu.core_type<tc>, window_params = [{transform_indices = @transform_0, window_bounds = array<i64: 128, 128>}, {transform_indices = @transform_1, window_bounds = array<i64: 128, 128>}, {transform_indices = @transform_2, window_bounds = array<i64: 128, 128>}, {pipeline_mode = #tpu.pipeline_mode<synchronous>, transform_indices = @transform_3, window_bounds = array<i64: 128, 128>}, {pipeline_mode = #tpu.pipeline_mode<synchronous>, transform_indices = @transform_4, window_bounds = array<i64: 128, 128>}, {transform_indices = @transform_5, window_bounds = array<i64: 128, 128>}]} {
    %c0_i32 = arith.constant 0 : i32
    %0 = arith.cmpi eq, %arg1, %c0_i32 : i32
    %1 = arith.extui %0 : i1 to i32
    %c0_i32_0 = arith.constant 0 : i32
    %2 = arith.cmpi ne, %1, %c0_i32_0 : i32
    scf.if %2 {
      %cst_10 = arith.constant 0.000000e+00 : f32
      %12 = vector.broadcast %cst_10 : f32 to vector<128x128xf32>
      %c0_11 = arith.constant 0 : index
      %c0_12 = arith.constant 0 : index
      %13 = vector.load %arg8[%c0_11, %c0_12] : memref<128x128xf32, #tpu.memory_space<vmem>>, vector<128x128xf32>
      tpu.vector_store %arg8[%c0_11, %c0_12], %12 {strides = array<i32>} : memref<128x128xf32, #tpu.memory_space<vmem>>, vector<128x128xf32>,
    } else {
    }
    %c0 = arith.constant 0 : index
    %c0_1 = arith.constant 0 : index
    %3 = vector.load %arg8[%c0, %c0_1] : memref<128x128xf32, #tpu.memory_space<vmem>>, vector<128x128xf32>
    %c0_2 = arith.constant 0 : index
    %c0_3 = arith.constant 0 : index
    %4 = vector.load %arg2[%c0_2, %c0_3] : memref<128x128xbf16, #tpu.memory_space<vmem>>, vector<128x128xbf16>
    %c0_4 = arith.constant 0 : index
    %c0_5 = arith.constant 0 : index
    %5 = vector.load %arg3[%c0_4, %c0_5] : memref<128x128xbf16, #tpu.memory_space<vmem>>, vector<128x128xbf16>
    %cst = arith.constant dense<0.000000e+00> : vector<128x128xf32>
    %6 = tpu.matmul %4, %5, %cst {dimension_numbers = #tpu.dot_dimension_numbers<[1], [0], [0], [1], [0, 0, 1, 1], [], []>} : vector<128x128xbf16>, vector<128x128xbf16>, vector<128x128xf32> -> vector<128x128xf32>
    %7 = arith.addf %3, %6 : vector<128x128xf32>
    %c0_6 = arith.constant 0 : index
    %c0_7 = arith.constant 0 : index
    %8 = vector.load %arg8[%c0_6, %c0_7] : memref<128x128xf32, #tpu.memory_space<vmem>>, vector<128x128xf32>
    tpu.vector_store %arg8[%c0_6, %c0_7], %7 {strides = array<i32>} : memref<128x128xf32, #tpu.memory_space<vmem>>, vector<128x128xf32>,
    %c0_i32_8 = arith.constant 0 : i32
    %9 = arith.cmpi eq, %arg1, %c0_i32_8 : i32
    %10 = arith.extui %9 : i1 to i32
    %c0_i32_9 = arith.constant 0 : i32
    %11 = arith.cmpi ne, %10, %c0_i32_9 : i32
    scf.if %11 {
      %c0_10 = arith.constant 0 : index
      %c0_11 = arith.constant 0 : index
      %12 = vector.load %arg8[%c0_10, %c0_11] : memref<128x128xf32, #tpu.memory_space<vmem>>, vector<128x128xf32>
      %13 = vector.extract_strided_slice %12 {offsets = [0, 0], sizes = [128, 1], strides = [1, 1]} : vector<128x128xf32> to vector<128x1xf32>
      %cst_12 = arith.constant 1.000000e+00 : f32
      %14 = vector.broadcast %cst_12 : f32 to vector<128x1xf32>
      %15 = arith.addf %13, %14 : vector<128x1xf32>
      %16 = tpu.reciprocal %15 {approx = true} : vector<128x1xf32> -> vector<128x1xf32>
      %17 = vector.broadcast %16 : vector<128x1xf32> to vector<128x128xf32>
      %18 = arith.mulf %12, %17 : vector<128x128xf32>
      %19 = arith.truncf %18 : vector<128x128xf32> to vector<128x128xbf16>
      %c0_13 = arith.constant 0 : index
      %c0_14 = arith.constant 0 : index
      %20 = vector.load %arg4[%c0_13, %c0_14] : memref<128x128xbf16, #tpu.memory_space<vmem>>, vector<128x128xbf16>
      %c0_15 = arith.constant 0 : index
      %c0_16 = arith.constant 0 : index
      %21 = vector.load %arg5[%c0_15, %c0_16] : memref<128x128xbf16, #tpu.memory_space<vmem>>, vector<128x128xbf16>
      %cst_17 = arith.constant dense<0.000000e+00> : vector<128x128xf32>
      %22 = tpu.matmul %20, %21, %cst_17 {dimension_numbers = #tpu.dot_dimension_numbers<[1], [0], [0], [1], [0, 0, 1, 1], [], []>} : vector<128x128xbf16>, vector<128x128xbf16>, vector<128x128xf32> -> vector<128x128xf32>
      %c0_18 = arith.constant 0 : index
      %c0_19 = arith.constant 0 : index
      %23 = vector.load %arg6[%c0_18, %c0_19] : memref<128x128xbf16, #tpu.memory_space<vmem>>, vector<128x128xbf16>
      %cst_20 = arith.constant dense<0.000000e+00> : vector<128x128xf32>
      %24 = tpu.matmul %19, %23, %cst_20 {dimension_numbers = #tpu.dot_dimension_numbers<[1], [0], [0], [1], [0, 0, 1, 1], [], []>} : vector<128x128xbf16>, vector<128x128xbf16>, vector<128x128xf32> -> vector<128x128xf32>
      %25 = arith.addf %22, %24 : vector<128x128xf32>
      %cst_21 = arith.constant 0.000000e+00 : f32
      %26 = vector.broadcast %cst_21 : f32 to vector<128x128xf32>
      %27 = arith.maximumf %25, %26 : vector<128x128xf32>
      %c0_22 = arith.constant 0 : index
      %c0_23 = arith.constant 0 : index
      %28 = vector.load %arg7[%c0_22, %c0_23] : memref<128x128xf32, #tpu.memory_space<vmem>>, vector<128x128xf32>
      tpu.vector_store %arg7[%c0_22, %c0_23], %27 {strides = array<i32>} : memref<128x128xf32, #tpu.memory_space<vmem>>, vector<128x128xf32>,
    } else {
    }
    return
  }
  func.func @transform_0(%arg0: i32, %arg1: i32) -> (i32, i32) {
    %c0_i32 = arith.constant 0 : i32
    return %arg0, %arg1 : i32, i32
  }
  func.func @transform_1(%arg0: i32, %arg1: i32) -> (i32, i32) {
    %c0_i32 = arith.constant 0 : i32
    %c0_i32_0 = arith.constant 0 : i32
    return %arg1, %c0_i32 : i32, i32
  }
  func.func @transform_2(%arg0: i32, %arg1: i32) -> (i32, i32) {
    %c0_i32 = arith.constant 0 : i32
    %c0_i32_0 = arith.constant 0 : i32
    return %arg0, %c0_i32 : i32, i32
  }
  func.func @transform_3(%arg0: i32, %arg1: i32) -> (i32, i32) {
    %c0_i32 = arith.constant 0 : i32
    %c0_i32_0 = arith.constant 0 : i32
    %c0_i32_1 = arith.constant 0 : i32
    return %c0_i32, %c0_i32_0 : i32, i32
  }
  func.func @transform_4(%arg0: i32, %arg1: i32) -> (i32, i32) {
    %c0_i32 = arith.constant 0 : i32
    %c0_i32_0 = arith.constant 0 : i32
    %c0_i32_1 = arith.constant 0 : i32
    return %c0_i32, %c0_i32_0 : i32, i32
  }
  func.func @transform_5(%arg0: i32, %arg1: i32) -> (i32, i32) {
    %c0_i32 = arith.constant 0 : i32
    %c0_i32_0 = arith.constant 0 : i32
    return %arg0, %c0_i32 : i32, i32
  }
}

</mosaic_0001>

<bundles_post_ra>
// kernel: tpu_custom_call.1
= control target key start
LH: loop header
LB: loop body
LE: loop exit
PB: predicated region body
PF: predicated region fallthrough
CT: control target
= control target key end

     0   :  { %10 = vsyncpa [#allocation4], 0  ;;  %s1670_s0 = inlined_call_operand.hbm [shape: bf16[128,128], index: 0, kind: input, shape index: {}]   ;;  %s1671_s1 = inlined_call_operand.hbm [shape: bf16[128,128], index: 1, kind: input, shape index: {}]   ;;  %s1672_s2 = inlined_call_operand.hbm [shape: bf16[128,128], index: 2, kind: input, shape index: {}]   ;;  %s1673_s3 = inlined_call_operand.hbm [shape: bf16[128,128], index: 3, kind: input, shape index: {}]   ;;  %s1674_s4 = inlined_call_operand.hbm [shape: bf16[128,128], index: 4, kind: input, shape index: {}]   ;;  %s1675_s5 = inlined_call_operand.hbm [shape: f32[128,128], index: 5, kind: output, shape index: {}]  }
   0x1   :  { %11 = vsyncpa [#allocation7], 0 }
   0x2   :  { %12 = vsyncpa [#allocation10], 0 }
   0x3   :  { %13 = vsyncpa [#allocation5], 0  ;;  %s1416_s18 = smov [#allocation6]   ;;  %s1417_s20 = smov [#allocation9]  }
   0x4   :  { %s31_s19 = sshll.u32 %s1416_s18, 4  ;;  %s55_s21 = sshll.u32 %s1417_s20, 4  ;;  %s32_s19 = int_to_ptr.vmem [resolvable:$true] %s31_s19  ;;  %s1457_s21 = int_to_ptr.vmem [resolvable:$true] %s55_s21 }
   0x5   :  { %s1276_s24 = scalar_lea.hbm %s1671_s1, 1024 }
   0x6   :  { %p1277_p0 = scmp.ne.s32.totalorder %s1671_s1, %s1276_s24  ;;  %p1280_p1 = scmp.lt.u32.totalorder %s1276_s24, %s1671_s1 }
   0x8   :  { %p1282_p2 = pnand %p1280_p1, %p1277_p0 }
   0xa   :  { %1285 = shalt.err (!%p1282_p2)
}
   0xb   :  { %s1286_s29 = scalar_lea.vmem %s32_s19, 1024  ;;  %p1291_p4 = scmp.lt.s32.totalorder %s32_s19, %s32_s19 }
   0xc   :  { %p1287_p3 = scmp.ne.s32.totalorder %s32_s19, %s1286_s29  ;;  %p1292_p5 = scmp.lt.s32.totalorder %s1286_s29, %s1286_s29 }
   0xe   :  { %p1293_p6 = por %p1292_p5, %p1291_p4 }
  0x10   :  { %p1294_p7 = pnand %p1293_p6, %p1287_p3 }
  0x12   :  { %1297 = shalt.err (!%p1294_p7)
}
  0x13   :  { %s1418_s30 = smov 64   ;;  %s1419_s6 = smov 4  }
  0x14   :  { %37 = dma.hbm_to_vmem [thread:$0]  %s1671_s1, 1024, %s32_s19, [#allocation7], %s1418_s30, %s1418_s30, %s1419_s6  }
  0x15   :  { %s1298_s11 = scalar_lea.hbm %s1673_s3, 1024 }
  0x16   :  { %p1299_p8 = scmp.ne.s32.totalorder %s1673_s3, %s1298_s11  ;;  %p1302_p9 = scmp.lt.u32.totalorder %s1298_s11, %s1673_s3 }
  0x18   :  { %p1304_p10 = pnand %p1302_p9, %p1299_p8 }
  0x1a   :  { %1307 = shalt.err (!%p1304_p10)
}
  0x1b   :  { %s1308_s16 = scalar_lea.vmem %s1457_s21, 1024  ;;  %p1313_p12 = scmp.lt.s32.totalorder %s1457_s21, %s1457_s21 }
  0x1c   :  { %p1309_p11 = scmp.ne.s32.totalorder %s1457_s21, %s1308_s16  ;;  %p1314_p13 = scmp.lt.s32.totalorder %s1308_s16, %s1308_s16 }
  0x1e   :  { %p1315_p0 = por %p1314_p13, %p1313_p12 }
  0x20   :  { %p1316_p1 = pnand %p1315_p0, %p1309_p11 }
  0x22   :  { %1319 = shalt.err (!%p1316_p1)
}
  0x23   :  { %61 = dma.hbm_to_vmem [thread:$0]  %s1673_s3, 1024, %s1457_s21, [#allocation10], %s1418_s30, %s1418_s30, %s1419_s6  }
  0x24   :  { %s1420_s18 = smov [#allocation3]   ;;  %s1421_s20 = smov [#allocation8]  }
  0x25   :  { %s19_s19 = sshll.u32 %s1420_s18, 4  ;;  %s43_s22 = sshll.u32 %s1421_s20, 4  ;;  %s20_s19 = int_to_ptr.vmem [resolvable:$true] %s19_s19  ;;  %s1494_s22 = int_to_ptr.vmem [resolvable:$true] %s43_s22 }
  0x26   :  { %s1320_s25 = scalar_lea.hbm %s1670_s0, 1024 }
  0x27   :  { %p1321_p2 = scmp.ne.s32.totalorder %s1670_s0, %s1320_s25  ;;  %p1324_p3 = scmp.lt.u32.totalorder %s1320_s25, %s1670_s0 }
  0x29   :  { %p1326_p4 = pnand %p1324_p3, %p1321_p2 }
  0x2b   :  { %1329 = shalt.err (!%p1326_p4)
}
  0x2c   :  { %s1330_s3 = scalar_lea.vmem %s20_s19, 1024  ;;  %p1335_p6 = scmp.lt.s32.totalorder %s20_s19, %s20_s19 }
  0x2d   :  { %p1331_p5 = scmp.ne.s32.totalorder %s20_s19, %s1330_s3  ;;  %p1336_p7 = scmp.lt.s32.totalorder %s1330_s3, %s1330_s3 }
  0x2f   :  { %p1337_p8 = por %p1336_p7, %p1335_p6 }
  0x31   :  { %p1338_p9 = pnand %p1337_p8, %p1331_p5 }
  0x33   :  { %1341 = shalt.err (!%p1338_p9)
}
  0x34   :  { %25 = dma.hbm_to_vmem [thread:$0]  %s1670_s0, 1024, %s20_s19, [#allocation4], %s1418_s30, %s1418_s30, %s1419_s6  }
  0x35   :  { %s1342_s10 = scalar_lea.hbm %s1672_s2, 1024 }
  0x36   :  { %p1343_p10 = scmp.ne.s32.totalorder %s1672_s2, %s1342_s10  ;;  %p1346_p11 = scmp.lt.u32.totalorder %s1342_s10, %s1672_s2 }
  0x38   :  { %p1348_p12 = pnand %p1346_p11, %p1343_p10 }
  0x3a   :  { %1351 = shalt.err (!%p1348_p12)
}
  0x3b   :  { %s1352_s15 = scalar_lea.vmem %s1494_s22, 1024  ;;  %p1357_p0 = scmp.lt.s32.totalorder %s1494_s22, %s1494_s22 }
  0x3c   :  { %p1353_p13 = scmp.ne.s32.totalorder %s1494_s22, %s1352_s15  ;;  %p1358_p1 = scmp.lt.s32.totalorder %s1352_s15, %s1352_s15 }
  0x3e   :  { %p1359_p2 = por %p1358_p1, %p1357_p0 }
  0x40   :  { %p1360_p3 = pnand %p1359_p2, %p1353_p13 }
  0x42   :  { %1363 = shalt.err (!%p1360_p3)
}
  0x43   :  { %49 = dma.hbm_to_vmem [thread:$0]  %s1672_s2, 1024, %s1494_s22, [#allocation7], %s1418_s30, %s1418_s30, %s1419_s6  }
  0x44   :  { %s1422_s1 = smov [#allocation11]   ;;  %s1364_s20 = scalar_lea.hbm %s1674_s4, 1024 }
  0x45   :  { %s67_s17 = sshll.u32 %s1422_s1, 4  ;;  %p1365_p4 = scmp.ne.s32.totalorder %s1674_s4, %s1364_s20  ;;  %s68_s17 = int_to_ptr.vmem [resolvable:$true] %s67_s17 }
  0x46   :  { %p1368_p5 = scmp.lt.u32.totalorder %s1364_s20, %s1674_s4 }
  0x48   :  { %p1370_p6 = pnand %p1368_p5, %p1365_p4 }
  0x4a   :  { %1373 = shalt.err (!%p1370_p6)
}
  0x4b   :  { %s1374_s27 = scalar_lea.vmem %s68_s17, 1024  ;;  %p1379_p8 = scmp.lt.s32.totalorder %s68_s17, %s68_s17 }
  0x4c   :  { %p1375_p7 = scmp.ne.s32.totalorder %s68_s17, %s1374_s27  ;;  %p1380_p9 = scmp.lt.s32.totalorder %s1374_s27, %s1374_s27 }
  0x4e   :  { %p1381_p10 = por %p1380_p9, %p1379_p8 }
  0x50   :  { %p1382_p11 = pnand %p1381_p10, %p1375_p7 }
  0x52   :  { %1385 = shalt.err (!%p1382_p11)
}
  0x53   :  { %73 = dma.hbm_to_vmem [thread:$0]  %s1674_s4, 1024, %s68_s17, [#allocation10], %s1418_s30, %s1418_s30, %s1419_s6  }
  0x54   :  { %1408 = dma.done.wait [#allocation4], 1024  }
  0x55   :  { %1409 = vsyncadd [#allocation4], 4294966272 }
  0x56   :  { %1410 = dma.done.wait [#allocation7], 2048  }
  0x57   :  { %1411 = vsyncadd [#allocation7], 4294965248 }
  0x58   :  { %1412 = dma.done.wait [#allocation10], 2048  }
  0x59   :  { %1413 = vsyncadd [#allocation10], 4294965248  ;;  %v1204_v0 = vld [vmem:[#allocation6] sm:$0xff]   ;;  %v1205_v1 = vld [vmem:[#allocation6 + $0x8] sm:$0xff]   ;;  %v1423_v16 = vmov 0   ;;  %s1424_s4 = smov [#allocation12]  }
  0x5a   :  { %1063 = vmatprep.subr.bf16.mxu0 %v1204_v0  ;;  %v1206_v2 = vld [vmem:[#allocation6 + $0x10] sm:$0xff]   ;;  %v1207_v3 = vld [vmem:[#allocation6 + $0x18] sm:$0xff]   ;;  %v1212_v4 = vld [vmem:[#allocation3] sm:$0xff]   ;;  %1203 = vset.pattern.permute.xlu1 %v1423_v16  ;;  %s961_s30 = sshll.u32 %s1424_s4, 4  ;;  %s962_s30 = int_to_ptr.vmem [resolvable:$true] %s961_s30 }
  0x5b   :  { %1064 = vmatpush3.bf16.msra.mxu0 %v1204_v0  ;;  %1079 = vmatprep.mubr.bf16.mxu0 %v1212_v4  ;;  %v1208_v5 = vld [vmem:[#allocation6 + $0x20] sm:$0xff]   ;;  %v1209_v6 = vld [vmem:[#allocation6 + $0x28] sm:$0xff]   ;;  %v1210_v7 = vld [vmem:[#allocation6 + $0x30] sm:$0xff]   ;;  %s1386_s6 = scalar_lea.vmem %s962_s30, 2048  ;;  %p1391_p13 = scmp.lt.s32.totalorder %s962_s30, %s962_s30 }
  0x5c   :  { %1065 = vmatprep.subr.bf16.mxu0 %v1205_v1  ;;  %v1211_v8 = vld [vmem:[#allocation6 + $0x38] sm:$0xff]   ;;  %v1213_v9 = vld [vmem:[#allocation3 + $0x8] sm:$0xff]   ;;  %v1214_v10 = vld [vmem:[#allocation3 + $0x10] sm:$0xff]   ;;  %1202 = vset.pattern.permute.xlu0 %v1423_v16  ;;  %p1387_p12 = scmp.ne.s32.totalorder %s962_s30, %s1386_s6  ;;  %p1392_p0 = scmp.lt.s32.totalorder %s1386_s6, %s1386_s6 }
  0x5d   :  { %v1215_v11 = vld [vmem:[#allocation3 + $0x18] sm:$0xff]   ;;  %v1216_v12 = vld [vmem:[#allocation3 + $0x20] sm:$0xff]   ;;  %v1217_v13 = vld [vmem:[#allocation3 + $0x28] sm:$0xff]  }
  0x5e   :  { %v1218_v14 = vld [vmem:[#allocation3 + $0x30] sm:$0xff]   ;;  %v1219_v15 = vld [vmem:[#allocation3 + $0x38] sm:$0xff]   ;;  %v1220_v17 = vld [vmem:[#allocation11] sm:$0xff]   ;;  %p1393_p1 = por %p1392_p0, %p1391_p13 }
  0x5f   :  { %1066 = vmatpush3.bf16.msra.mxu0 %v1205_v1  ;;  %v1546_v18 = vld [vmem:[#allocation9] sm:$0xff]   ;;  %v1222_v19 = vld [vmem:[#allocation11 + $0x8] sm:$0xff]   ;;  %1095 = vmatprep.subr.bf16.mxu1 %v1220_v17  ;;  %v1224_v21 = vld [vmem:[#allocation11 + $0x10] sm:$0xff]  }
  0x60   :  { %1067 = vmatprep.subr.bf16.mxu0 %v1206_v2  ;;  %v1548_v20 = vld [vmem:[#allocation9 + $0x8] sm:$0xff]   ;;  %1096 = vmatpush3.bf16.msra.mxu1 %v1220_v17  ;;  %v1553_v22 = vld [vmem:[#allocation9 + $0x10] sm:$0xff]   ;;  %v1226_v23 = vld [vmem:[#allocation11 + $0x18] sm:$0xff]   ;;  %p1394_p2 = pnand %p1393_p1, %p1387_p12 }
  0x61   :  { %1097 = vmatprep.subr.bf16.mxu1 %v1222_v19  ;;  %v1557_v24 = vld [vmem:[#allocation9 + $0x18] sm:$0xff]   ;;  %v1228_v25 = vld [vmem:[#allocation11 + $0x20] sm:$0xff]   ;;  %v1230_v27 = vld [vmem:[#allocation11 + $0x28] sm:$0xff]  }
  0x62   :  { %v1561_v26 = vld [vmem:[#allocation9 + $0x20] sm:$0xff]   ;;  %v1565_v28 = vld [vmem:[#allocation9 + $0x28] sm:$0xff]   ;;  %v1232_v47 = vld [vmem:[#allocation11 + $0x30] sm:$0xff]  }
  0x63   :  { %1068 = vmatpush3.bf16.msra.mxu0 %v1206_v2  ;;  %v1594_v48 = vld [vmem:[#allocation9 + $0x30] sm:$0xff]   ;;  %v1234_v55 = vld [vmem:[#allocation11 + $0x38] sm:$0xff]   ;;  %v1236_v60 = vld [vmem:[#allocation8] sm:$0xff]  }
  0x64   :  { %1069 = vmatprep.subr.bf16.mxu0 %v1207_v3  ;;  %1098 = vmatpush3.bf16.msra.mxu1 %v1222_v19  ;;  %v1605_v56 = vld [vmem:[#allocation9 + $0x38] sm:$0xff]   ;;  %v1237_v63 = vld [vmem:[#allocation8 + $0x8] sm:$0xff]  }
  0x65   :  { %1099 = vmatprep.subr.bf16.mxu1 %v1224_v21 }
  0x67   :  { %1070 = vmatpush3.bf16.msra.mxu0 %v1207_v3 }
  0x68   :  { %1071 = vmatprep.subr.bf16.mxu0 %v1208_v5  ;;  %1100 = vmatpush3.bf16.msra.mxu1 %v1224_v21 }
  0x69   :  { %1101 = vmatprep.subr.bf16.mxu1 %v1226_v23 }
  0x6b   :  { %1072 = vmatpush3.bf16.msra.mxu0 %v1208_v5 }
  0x6c   :  { %1073 = vmatprep.subr.bf16.mxu0 %v1209_v6  ;;  %1102 = vmatpush3.bf16.msra.mxu1 %v1226_v23 }
  0x6d   :  { %1103 = vmatprep.subr.bf16.mxu1 %v1228_v25 }
  0x6f   :  { %1074 = vmatpush3.bf16.msra.mxu0 %v1209_v6 }
  0x70   :  { %1075 = vmatprep.subr.bf16.mxu0 %v1210_v7  ;;  %1104 = vmatpush3.bf16.msra.mxu1 %v1228_v25 }
  0x71   :  { %1105 = vmatprep.subr.bf16.mxu1 %v1230_v27 }
  0x73   :  { %1076 = vmatpush3.bf16.msra.mxu0 %v1210_v7 }
  0x74   :  { %1077 = vmatprep.subr.bf16.mxu0 %v1211_v8  ;;  %1106 = vmatpush3.bf16.msra.mxu1 %v1230_v27 }
  0x75   :  { %1107 = vmatprep.subr.bf16.mxu1 %v1232_v47 }
  0x77   :  { %1078 = vmatpush3.bf16.msra.mxu0 %v1211_v8 }
  0x78   :  { %1127 = vmatprep.subr.bf16.mxu0 %v1546_v18  ;;  %1108 = vmatpush3.bf16.msra.mxu1 %v1232_v47 }
  0x79   :  { %1109 = vmatprep.subr.bf16.mxu1 %v1234_v55 }
  0x7a   :  { %1080 = vmatmul.mubr.bf16.vlgmr.msra.gmra.mrb[0].mxu0 %v1213_v9 }
  0x7b   :  { %1083 = vmatprep.mubr.bf16.mxu0 %v1214_v10  ;;  %1128 = vmatpush3.bf16.msra.mxu0 %v1546_v18 }
  0x7c   :  { %1129 = vmatprep.subr.bf16.mxu0 %v1548_v20  ;;  %1110 = vmatpush3.bf16.msra.mxu1 %v1234_v55 }
  0x7d   :  { %1159 = vmatprep.subr.bf16.mxu1 %v1546_v18 }
  0x7f   :  { %1130 = vmatpush3.bf16.msra.mxu0 %v1548_v20 }
  0x80   :  { %1131 = vmatprep.subr.bf16.mxu0 %v1553_v22 }
  0x82   :  { %1084 = vmatmul.mubr.bf16.gmra.mrb[4].mxu0 %v1215_v11 }
  0x83   :  { %1087 = vmatprep.mubr.bf16.mxu0 %v1216_v12  ;;  %1132 = vmatpush3.bf16.msra.mxu0 %v1553_v22  ;;  %v1238_v12 = vld [vmem:[#allocation8 + $0x10] sm:$0xff]  }
  0x84   :  { %1133 = vmatprep.subr.bf16.mxu0 %v1557_v24 }
  0x87   :  { %1134 = vmatpush3.bf16.msra.mxu0 %v1557_v24 }
  0x88   :  { %1135 = vmatprep.subr.bf16.mxu0 %v1561_v26 }
  0x8a   :  { %1088 = vmatmul.mubr.bf16.gmra.mrb[8].mxu0 %v1217_v13  ;;  %v1239_v13 = vld [vmem:[#allocation8 + $0x18] sm:$0xff]  }
  0x8b   :  { %1091 = vmatprep.mubr.bf16.mxu0 %v1218_v14  ;;  %1136 = vmatpush3.bf16.msra.mxu0 %v1561_v26 }
  0x8c   :  { %1137 = vmatprep.subr.bf16.mxu0 %v1565_v28 }
  0x8f   :  { %1138 = vmatpush3.bf16.msra.mxu0 %v1565_v28 }
  0x90   :  { %1139 = vmatprep.subr.bf16.mxu0 %v1594_v48 }
  0x92   :  { %1092 = vmatmul.mubr.bf16.gmra.mrb[12].mxu0 %v1219_v15 }
  0x93   :  { %1140 = vmatpush3.bf16.msra.mxu0 %v1594_v48  ;;  %1143 = vmatprep.mubr.bf16.mxu0 %v1236_v60 }
  0x94   :  { %1141 = vmatprep.subr.bf16.mxu0 %v1605_v56 }
  0x97   :  { %1142 = vmatpush3.bf16.msra.mxu0 %v1605_v56 }
  0x9a   :  { %1144 = vmatmul.mubr.bf16.vlgmr.msra.gmra.mrb[16].mxu0 %v1237_v63 }
  0x9b   :  { %1147 = vmatprep.mubr.bf16.mxu0 %v1238_v12 }
  0xa2   :  { %1148 = vmatmul.mubr.bf16.gmra.mrb[20].mxu0 %v1239_v13 }
 0x14d   :  { %v1570_v29 = vpop.f32.mrb[0].mxu0 }
 0x14e   :  { %v404_v30 = vadd.f32 1.0, %v1570_v29  ;;  %v1573_v31 = vpop.f32.mrb[1].mxu0 }
 0x14f   :  { %v402_v32 = vadd.f32 1.0, %v1573_v31  ;;  %v1576_v33 = vpop.f32.mrb[2].mxu0 }
 0x150   :  { %1244 = vrcp.f32 %v404_v30  ;;  %v405_v34 = vadd.f32 1.0, %v1576_v33  ;;  %v1579_v35 = vpop.f32.mrb[3].mxu0 }
 0x151   :  { %1246 = vrcp.f32 %v402_v32  ;;  %v403_v36 = vadd.f32 1.0, %v1579_v35 }
 0x152   :  { %1248 = vrcp.f32 %v405_v34 }
 0x153   :  { %1250 = vrcp.f32 %v403_v36 }
 0x155   :  { %v1582_v37 = vpop.f32.mrb[4].mxu0 }
 0x156   :  { %v1584_v38 = vpop.f32.mrb[5].mxu0  ;;  %v408_v42 = vadd.f32 1.0, %v1582_v37 }
 0x157   :  { %v406_v39 = vadd.f32 1.0, %v1584_v38  ;;  %v1587_v40 = vpop.f32.mrb[6].mxu0 }
 0x158   :  { %v1589_v41 = vpop.f32.mrb[7].mxu0  ;;  %v409_v46 = vadd.f32 1.0, %v1587_v40 }
 0x159   :  { %1252 = vrcp.f32 %v406_v39  ;;  %v407_v43 = vadd.f32 1.0, %v1589_v41 }
 0x15a   :  { %v1245_v44 = vpop.eup %1244 }
 0x15b   :  { %v1247_v45 = vpop.eup %1246  ;;  %1254 = vrcp.f32 %v407_v43  ;;  %446 = vperm.xlu1 %1203, %v1245_v44  }
 0x15c   :  { %436 = vperm.xlu0 %1202, %v1247_v45   ;;  %1256 = vrcp.f32 %v408_v42  ;;  %v1249_v50 = vpop.eup %1248 }
 0x15d   :  { %v1596_v49 = vpop.f32.mrb[8].mxu0  ;;  %v1251_v52 = vpop.eup %1250  ;;  %1258 = vrcp.f32 %v409_v46 }
 0x15e   :  { %v1599_v51 = vpop.f32.mrb[9].mxu0  ;;  %v412_v58 = vadd.f32 1.0, %v1596_v49 }
 0x15f   :  { %v410_v53 = vadd.f32 1.0, %v1599_v51  ;;  %451 = vperm.xlu1 %1203, %v1249_v50   ;;  %v1603_v54 = vpop.f32.mrb[10].mxu0 }
 0x160   :  { %441 = vperm.xlu0 %1202, %v1251_v52   ;;  %v1607_v57 = vpop.f32.mrb[11].mxu0  ;;  %v413_v62 = vadd.f32 1.0, %v1603_v54 }
 0x161   :  { %1260 = vrcp.f32 %v410_v53  ;;  %v411_v59 = vadd.f32 1.0, %v1607_v57 }
 0x163   :  { %v1253_v61 = vpop.eup %1252  ;;  %1262 = vrcp.f32 %v411_v59 }
 0x164   :  { %456 = vperm.xlu0 %1202, %v1253_v61   ;;  %1264 = vrcp.f32 %v412_v58 }
 0x165   :  { %v1255_v0 = vpop.eup %1254  ;;  %v1615_v1 = vpop.f32.mrb[12].mxu0  ;;  %1266 = vrcp.f32 %v413_v62 }
 0x166   :  { %461 = vperm.xlu1 %1203, %v1255_v0   ;;  %v1617_v2 = vpop.f32.mrb[13].mxu0  ;;  %v1257_v3 = vpop.eup %1256  ;;  %v416_v8 = vadd.f32 1.0, %v1615_v1  ;;  %v1240_v0 = vld [vmem:[#allocation8 + $0x20] sm:$0xff]  }
 0x167   :  { %v414_v4 = vadd.f32 1.0, %v1617_v2  ;;  %v1620_v5 = vpop.f32.mrb[14].mxu0  ;;  %v1259_v7 = vpop.eup %1258 }
 0x168   :  { %466 = vperm.xlu0 %1202, %v1257_v3   ;;  %v1622_v6 = vpop.f32.mrb[15].mxu0  ;;  %v417_v11 = vadd.f32 1.0, %v1620_v5 }
 0x169   :  { %1268 = vrcp.f32 %v414_v4  ;;  %v415_v9 = vadd.f32 1.0, %v1622_v6 }
 0x16a   :  { %471 = vperm.xlu1 %1203, %v1259_v7  }
 0x16b   :  { %v1261_v10 = vpop.eup %1260  ;;  %1270 = vrcp.f32 %v415_v9 }
 0x16c   :  { %476 = vperm.xlu0 %1202, %v1261_v10   ;;  %1272 = vrcp.f32 %v416_v8 }
 0x16d   :  { %v1263_v14 = vpop.eup %1262  ;;  %1274 = vrcp.f32 %v417_v11  ;;  %v1145_v4 = vpop.f32.mrb[16].mxu0 }
 0x16e   :  { %481 = vperm.xlu1 %1203, %v1263_v14   ;;  %v1265_v15 = vpop.eup %1264 }
 0x16f   :  { %v1267_v16 = vpop.eup %1266 }
 0x170   :  { %486 = vperm.xlu0 %1202, %v1265_v15  }
 0x172   :  { %491 = vperm.xlu1 %1203, %v1267_v16  }
 0x173   :  { %v1269_v17 = vpop.eup %1268 }
 0x174   :  { %496 = vperm.xlu0 %1202, %v1269_v17  }
 0x175   :  { %v1271_v19 = vpop.eup %1270 }
 0x176   :  { %501 = vperm.xlu1 %1203, %v1271_v19   ;;  %v1273_v21 = vpop.eup %1272 }
 0x177   :  { %v1275_v23 = vpop.eup %1274 }
 0x178   :  { %506 = vperm.xlu0 %1202, %v1273_v21  }
 0x17a   :  { %511 = vperm.xlu1 %1203, %v1275_v23  }
 0x1da   :  { %v447_v25 = vpop.permute.xlu1 %446 }
 0x1db   :  { %v437_v27 = vpop.permute.xlu0 %436  ;;  %v516_v32 = vmul.f32 %v1570_v29, %v447_v25 }
 0x1dc   :  { %v514_v39 = vmul.f32 %v437_v27, %v1573_v31 }
 0x1de   :  { %v452_v30 = vpop.permute.xlu1 %451 }
 0x1df   :  { %v517_v34 = vmul.f32 %v1576_v33, %v452_v30  ;;  %v442_v36 = vpop.permute.xlu0 %441 }
 0x1e0   :  { %v515_v42 = vmul.f32 %v442_v36, %v1579_v35 }
 0x1e1   :  { %v531_v43 = vpack.c.bf16 %v517_v34, %v516_v32 }
 0x1e2   :  { %v530_v44 = vpack.c.bf16 %v515_v42, %v514_v39 }
 0x1e3   :  { %v457_v45 = vpop.permute.xlu0 %456 }
 0x1e4   :  { %1111 = vmatprep.mubr.bf16.mxu1 %v530_v44  ;;  %v518_v47 = vmul.f32 %v457_v45, %v1584_v38 }
 0x1e5   :  { %1112 = vmatmul.mubr.bf16.vlgmr.msra.gmra.mrb[0].mxu1 %v531_v43  ;;  %v462_v46 = vpop.permute.xlu1 %461 }
 0x1e6   :  { %v519_v50 = vmul.f32 %v462_v46, %v1589_v41  ;;  %1167 = vmatpush3.bf16.msra.mxu1 %v1546_v18 }
 0x1e7   :  { %v467_v29 = vpop.permute.xlu0 %466  ;;  %1160 = vmatprep.subr.bf16.mxu1 %v1548_v20 }
 0x1e8   :  { %v532_v33 = vpack.c.bf16 %v519_v50, %v518_v47  ;;  %v520_v31 = vmul.f32 %v1582_v37, %v467_v29 }
 0x1e9   :  { %v472_v52 = vpop.permute.xlu1 %471 }
 0x1ea   :  { %v521_v35 = vmul.f32 %v1587_v40, %v472_v52  ;;  %1115 = vmatprep.mubr.bf16.mxu1 %v532_v33  ;;  %1168 = vmatpush3.bf16.msra.mxu1 %v1548_v20 }
 0x1eb   :  { %v477_v53 = vpop.permute.xlu0 %476  ;;  %1161 = vmatprep.subr.bf16.mxu1 %v1553_v22 }
 0x1ec   :  { %v533_v38 = vpack.c.bf16 %v521_v35, %v520_v31  ;;  %v522_v41 = vmul.f32 %v477_v53, %v1599_v51 }
 0x1ed   :  { %v482_v55 = vpop.permute.xlu1 %481 }
 0x1ee   :  { %v523_v18 = vmul.f32 %v482_v55, %v1607_v57  ;;  %1116 = vmatmul.mubr.bf16.gmra.mrb[4].mxu1 %v533_v38 }
 0x1ef   :  { %1169 = vmatpush3.bf16.msra.mxu1 %v1553_v22  ;;  %v487_v58 = vpop.permute.xlu0 %486 }
 0x1f0   :  { %v534_v59 = vpack.c.bf16 %v523_v18, %v522_v41  ;;  %1162 = vmatprep.subr.bf16.mxu1 %v1557_v24  ;;  %v524_v40 = vmul.f32 %v1596_v49, %v487_v58 }
 0x1f1   :  { %v492_v37 = vpop.permute.xlu1 %491 }
 0x1f2   :  { %v525_v20 = vmul.f32 %v1603_v54, %v492_v37  ;;  %1119 = vmatprep.mubr.bf16.mxu1 %v534_v59 }
 0x1f3   :  { %1170 = vmatpush3.bf16.msra.mxu1 %v1557_v24  ;;  %v497_v60 = vpop.permute.xlu0 %496 }
 0x1f4   :  { %v535_v61 = vpack.c.bf16 %v525_v20, %v524_v40  ;;  %1163 = vmatprep.subr.bf16.mxu1 %v1561_v26  ;;  %v526_v57 = vmul.f32 %v497_v60, %v1617_v2  ;;  %v1242_v2 = vld [vmem:[#allocation8 + $0x30] sm:$0xff]  }
 0x1f5   :  { %v502_v51 = vpop.permute.xlu1 %501 }
 0x1f6   :  { %v527_v22 = vmul.f32 %v502_v51, %v1622_v6  ;;  %1120 = vmatmul.mubr.bf16.gmra.mrb[8].mxu1 %v535_v61 }
 0x1f7   :  { %1171 = vmatpush3.bf16.msra.mxu1 %v1561_v26  ;;  %v507_v62 = vpop.permute.xlu0 %506  ;;  %v1241_v26 = vld [vmem:[#allocation8 + $0x28] sm:$0xff]  }
 0x1f8   :  { %v536_v63 = vpack.c.bf16 %v527_v22, %v526_v57  ;;  %1164 = vmatprep.subr.bf16.mxu1 %v1565_v28  ;;  %v528_v54 = vmul.f32 %v1615_v1, %v507_v62  ;;  %v1243_v1 = vld [vmem:[#allocation8 + $0x38] sm:$0xff]  }
 0x1f9   :  { %v512_v49 = vpop.permute.xlu1 %511 }
 0x1fa   :  { %v529_v24 = vmul.f32 %v1620_v5, %v512_v49  ;;  %1123 = vmatprep.mubr.bf16.mxu1 %v536_v63 }
 0x1fb   :  { %1172 = vmatpush3.bf16.msra.mxu1 %v1565_v28  ;;  %v861_v28 = vpop.f32.mrb[17].mxu0 }
 0x1fc   :  { %v537_v3 = vpack.c.bf16 %v529_v24, %v528_v54  ;;  %1165 = vmatprep.subr.bf16.mxu1 %v1594_v48  ;;  %v1146_v5 = vpop.f32.mrb[18].mxu0 }
 0x1fd   :  { %v864_v6 = vpop.f32.mrb[19].mxu0 }
 0x1fe   :  { %1124 = vmatmul.mubr.bf16.gmra.mrb[12].mxu1 %v537_v3  ;;  %v1149_v7 = vpop.f32.mrb[20].mxu0 }
 0x1ff   :  { %1173 = vmatpush3.bf16.msra.mxu1 %v1594_v48  ;;  %1151 = vmatprep.mubr.bf16.mxu1 %v1240_v0  ;;  %v877_v8 = vpop.f32.mrb[21].mxu0 }
 0x200   :  { %1166 = vmatprep.subr.bf16.mxu1 %v1605_v56  ;;  %v1150_v9 = vpop.f32.mrb[22].mxu0 }
 0x201   :  { %v880_v10 = vpop.f32.mrb[23].mxu0 }
 0x203   :  { %1174 = vmatpush3.bf16.msra.mxu1 %v1605_v56 }
 0x206   :  { %1152 = vmatmul.mubr.bf16.vlgmr.msra.gmra.mrb[8].mxu1 %v1241_v26 }
 0x207   :  { %1155 = vmatprep.mubr.bf16.mxu1 %v1242_v2 }
 0x20e   :  { %1156 = vmatmul.mubr.bf16.gmra.mrb[12].mxu1 %v1243_v1 }
 0x2b8   :  { %v1113_v48 = vpop.f32.mrb[0].mxu1 }
 0x2b9   :  { %v870_v11 = vadd.f32 %v1145_v4, %v1113_v48  ;;  %v668_v12 = vpop.f32.mrb[1].mxu1 }
 0x2ba   :  { %v862_v13 = vadd.f32 %v861_v28, %v668_v12  ;;  %v1114_v14 = vpop.f32.mrb[2].mxu1 }
 0x2bb   :  { %v926_v15 = vmax.f32 %v870_v11, 0.0  ;;  %v873_v56 = vadd.f32 %v1146_v5, %v1114_v14  ;;  %v671_v16 = vpop.f32.mrb[3].mxu1 }
 0x2bc   :  { %v924_v17 = vmax.f32 %v862_v13, 0.0  ;;  %v865_v19 = vadd.f32 %v864_v6, %v671_v16 }
 0x2bd   :  { %942 = vst [vmem:[#allocation12 + $0x10] sm:$0xff] %v926_v15  ;;  %v927_v21 = vmax.f32 %v873_v56, 0.0 }
 0x2be   :  { %940 = vst [vmem:[#allocation12] sm:$0xff] %v924_v17  ;;  %v925_v23 = vmax.f32 %v865_v19, 0.0 }
 0x2bf   :  { %943 = vst [vmem:[#allocation12 + $0x18] sm:$0xff] %v927_v21 }
 0x2c0   :  { %941 = vst [vmem:[#allocation12 + $0x8] sm:$0xff] %v925_v23 }
 0x2c1   :  { %v1117_v25 = vpop.f32.mrb[4].mxu1 }
 0x2c2   :  { %v886_v27 = vadd.f32 %v1149_v7, %v1117_v25  ;;  %v684_v30 = vpop.f32.mrb[5].mxu1 }
 0x2c3   :  { %v878_v32 = vadd.f32 %v877_v8, %v684_v30  ;;  %v1118_v34 = vpop.f32.mrb[6].mxu1 }
 0x2c4   :  { %v930_v36 = vmax.f32 %v886_v27, 0.0  ;;  %v889_v39 = vadd.f32 %v1150_v9, %v1118_v34  ;;  %v687_v42 = vpop.f32.mrb[7].mxu1 }
 0x2c5   :  { %v928_v43 = vmax.f32 %v878_v32, 0.0  ;;  %v881_v44 = vadd.f32 %v880_v10, %v687_v42 }
 0x2c6   :  { %946 = vst [vmem:[#allocation12 + $0x30] sm:$0xff] %v930_v36  ;;  %v931_v45 = vmax.f32 %v889_v39, 0.0 }
 0x2c7   :  { %944 = vst [vmem:[#allocation12 + $0x20] sm:$0xff] %v928_v43  ;;  %v929_v46 = vmax.f32 %v881_v44, 0.0 }
 0x2c8   :  { %947 = vst [vmem:[#allocation12 + $0x38] sm:$0xff] %v931_v45 }
 0x2c9   :  { %945 = vst [vmem:[#allocation12 + $0x28] sm:$0xff] %v929_v46 }
 0x2d9   :  { %v1153_v47 = vpop.f32.mrb[8].mxu1 }
 0x2da   :  { %v934_v50 = vmax.f32 %v1153_v47, 0.0  ;;  %v893_v29 = vpop.f32.mrb[9].mxu1 }
 0x2db   :  { %v932_v33 = vmax.f32 %v893_v29, 0.0  ;;  %v1154_v52 = vpop.f32.mrb[10].mxu1 }
 0x2dc   :  { %950 = vst [vmem:[#allocation12 + $0x50] sm:$0xff] %v934_v50  ;;  %v935_v31 = vmax.f32 %v1154_v52, 0.0  ;;  %v896_v35 = vpop.f32.mrb[11].mxu1 }
 0x2dd   :  { %948 = vst [vmem:[#allocation12 + $0x40] sm:$0xff] %v932_v33  ;;  %v933_v53 = vmax.f32 %v896_v35, 0.0 }
 0x2de   :  { %951 = vst [vmem:[#allocation12 + $0x58] sm:$0xff] %v935_v31 }
 0x2df   :  { %949 = vst [vmem:[#allocation12 + $0x48] sm:$0xff] %v933_v53 }
 0x2e1   :  { %v1157_v38 = vpop.f32.mrb[12].mxu1 }
 0x2e2   :  { %v938_v55 = vmax.f32 %v1157_v38, 0.0  ;;  %v909_v41 = vpop.f32.mrb[13].mxu1 }
 0x2e3   :  { %v936_v18 = vmax.f32 %v909_v41, 0.0  ;;  %v1158_v58 = vpop.f32.mrb[14].mxu1 }
 0x2e4   :  { %954 = vst [vmem:[#allocation12 + $0x70] sm:$0xff] %v938_v55  ;;  %v939_v59 = vmax.f32 %v1158_v58, 0.0  ;;  %v912_v37 = vpop.f32.mrb[15].mxu1 }
 0x2e5   :  { %952 = vst [vmem:[#allocation12 + $0x60] sm:$0xff] %v936_v18  ;;  %v937_v40 = vmax.f32 %v912_v37, 0.0 }
 0x2e6   :  { %955 = vst [vmem:[#allocation12 + $0x78] sm:$0xff] %v939_v59 }
 0x2e7   :  { %953 = vst [vmem:[#allocation12 + $0x68] sm:$0xff] %v937_v40 }
 0x2e8   :  { %1397 = shalt.err (!%p1394_p2)
}
 0x2e9   :  { %s1398_s3 = scalar_lea.hbm %s1675_s5, 2048 }
 0x2ea   :  { %p1399_p3 = scmp.ne.s32.totalorder %s1675_s5, %s1398_s3  ;;  %p1402_p4 = scmp.lt.u32.totalorder %s1398_s3, %s1675_s5 }
 0x2ec   :  { %p1404_p5 = pnand %p1402_p4, %p1399_p3 }
 0x2ee   :  { %1407 = shalt.err (!%p1404_p5)
}
 0x2ef   :  { %s1425_s10 = smov 128   ;;  %s1426_s11 = smov 8  }
 0x2f0   :  { %967 = dma.vmem_to_hbm [thread:$0]  %s962_s30, 2048, %s1675_s5, [#allocation5], %s1425_s10, %s1425_s10, %s1426_s11  }
 0x2f1   :  { %1414 = dma.done.wait [#allocation5], 2048  }
 0x2f2   :  { %1415 = vsyncadd [#allocation5], 4294965248 }
 0x2f3   :  { %971 = vsyncpa [#allocation4], 1 }
 0x2f4   :  { %972 = vsyncpa [#allocation7], 1 }
 0x2f5   :  { %973 = vsyncpa [#allocation10], 1 }
 0x2f6   :  { %974 = vsyncpa [#allocation5], 1 }

</bundles_post_ra>
